<compile_context>
chip_gen: v7x
topology: tpu7x:2x2x1
jax: 0.10.0
libtpu: 0.0.40
codegen_flags: <defaults>
</compile_context>

<pallas_src>
import functools

import jax
import jax.numpy as jnp
from jax.experimental import pallas as pl
from jax.experimental.pallas import tpu as pltpu

BN_EPS = 1e-5  # PyTorch BatchNorm1d default


# ----------------------------------------------------------------------------
# Kernel: fused  max(dim=batch)  ->  Linear  ->  ReLU  ->  BN(eval) scale/shift.
# Grid: (view-tile i [parallel], batch-reduction tile j [arbitrary, innermost]).
# ----------------------------------------------------------------------------
def wsinet_head_kernel(feats_ref,            # (TILE_V, TILE_B, F)      f32
                       w_ref,                # (F, OUT_PAD)             bf16
                       params_ref,           # (8, OUT_PAD)             f32
                                             #   row0 bias, row1 scale, row2 shift
                       out_ref,              # (1, TILE_V, OUT_PAD)     f32
                       maxacc_ref,           # scratch (TILE_V, F)      f32
                       *, b_total, tile_b, mask_last):
    j = pl.program_id(1)
    last = pl.num_programs(1) - 1

    def accumulate(blk_max):
        # First reduction tile writes directly (no -inf init pass needed).
        @pl.when(j == 0)
        def _():
            maxacc_ref[...] = blk_max

        @pl.when(j > 0)
        def _():
            maxacc_ref[...] = jnp.maximum(maxacc_ref[...], blk_max)

    if mask_last:
        # Only the LAST batch tile can be partial: mask it there, fast path
        # everywhere else (traced only when B % TILE_B != 0).
        @pl.when(j == last)
        def _():
            valid = b_total - j * tile_b
            row_ids = jax.lax.broadcasted_iota(jnp.int32, (1, tile_b, 1), 1)
            blk = jnp.where(row_ids < valid, feats_ref[...],
                            jnp.float32(-jnp.inf))
            accumulate(jnp.max(blk, axis=1))

        @pl.when(j != last)
        def _():
            accumulate(jnp.max(feats_ref[...], axis=1))
    else:
        accumulate(jnp.max(feats_ref[...], axis=1))

    # Finalize: FC head on the pooled features (only at the last batch tile).
    @pl.when(j == last)
    def _():
        patch = maxacc_ref[...].astype(jnp.bfloat16)      # bf16 only for the MXU
        p = params_ref[...]
        bias, scale, shift = p[0:1, :], p[1:2, :], p[2:3, :]
        h = jnp.dot(patch, w_ref[...], preferred_element_type=jnp.float32)
        h = jnp.maximum(h + bias, 0.0)                    # Linear bias + ReLU
        # BatchNorm1d (eval) pre-folded into scale/shift (applied AFTER ReLU).
        # TODO(synk): training-mode batch statistics (reduce over V) not implemented.
        out_ref[0] = (h * scale + shift).astype(out_ref.dtype)


# ----------------------------------------------------------------------------
# Wrapper.
# ----------------------------------------------------------------------------
@functools.partial(jax.jit, static_argnames=("out_features",))
def wsinet_forward(view_features, params, *, out_features):
    """view_features: (V, B, F) stacked per-view backbone features (f32)."""
    V, B, F = view_features.shape
    w, b, gamma, beta, mean, var = params

    # Lane-dense final layer: pad output columns up to a multiple of 128.
    OUT_PAD = max(128, pl.cdiv(out_features, 128) * 128)
    pad_n = OUT_PAD - out_features
    w_p = jnp.pad(w, ((0, 0), (0, pad_n))).astype(jnp.bfloat16)

    # Fold BN eval affine into post-ReLU scale/shift; pack bias/scale/shift
    # into a single (8, OUT_PAD) grid-invariant operand (one DMA, one ref).
    scale = gamma / jnp.sqrt(var + BN_EPS)                # (1, out)
    shift = beta - mean * scale                           # (1, out)
    packed = jnp.zeros((8, OUT_PAD), jnp.float32)
    packed = packed.at[0, :out_features].set(b[0])
    packed = packed.at[1, :out_features].set(scale[0])
    packed = packed.at[2, :out_features].set(shift[0])

    # ---- tiling -------------------------------------------------------------
    # View axis: >= 2 grid steps whenever V >= 2 so both v7x TCs stream.
    if V <= 8:
        TILE_V = max(1, pl.cdiv(V, 2))
    else:
        TILE_V = 8
    n_vtiles = pl.cdiv(V, TILE_V)

    # Batch-reduction axis: biggest block (<= 512 rows, multiple of 16) such
    # that the double-buffered f32 feature block stays <= ~32 MiB (v7x VMEM).
    BLOCK_BUDGET = 16 * 1024 * 1024                       # per buffer
    max_tb = max(16, (BLOCK_BUDGET // (TILE_V * F * 4)) // 16 * 16)
    TILE_B = min(B, 512, max_tb)
    if TILE_B < B:
        TILE_B = max(16, (TILE_B // 16) * 16)
    grid = (n_vtiles, pl.cdiv(B, TILE_B))
    mask_last = (B % TILE_B) != 0

    kernel = functools.partial(wsinet_head_kernel,
                               b_total=B, tile_b=TILE_B, mask_last=mask_last)

    # VMEM footprint -> raise the scoped limit accordingly (fits all gens).
    vmem_bytes = (2 * TILE_V * TILE_B * F * 4             # feats double buffer
                  + 2 * F * OUT_PAD * 2                   # weight double buffer
                  + 2 * 8 * OUT_PAD * 4                   # packed params
                  + 2 * TILE_V * OUT_PAD * 4              # output double buffer
                  + TILE_V * F * 4)                       # max accumulator
    vmem_limit = int(min(max(vmem_bytes + (8 << 20), 32 << 20), 48 << 20))

    flops = 2 * V * F * OUT_PAD + V * B * F               # matmul + max-reduce
    bytes_accessed = (V * B * F * 4 + F * OUT_PAD * 2 + 8 * OUT_PAD * 4
                      + n_vtiles * TILE_V * OUT_PAD * 4)

    out = pl.pallas_call(
        kernel,
        out_shape=jax.ShapeDtypeStruct((n_vtiles, TILE_V, OUT_PAD), jnp.float32),
        grid_spec=pltpu.PrefetchScalarGridSpec(
            num_scalar_prefetch=0,
            grid=grid,
            in_specs=[
                pl.BlockSpec((TILE_V, TILE_B, F), lambda i, j: (i, j, 0)),
                pl.BlockSpec((F, OUT_PAD), lambda i, j: (0, 0)),   # weights
                pl.BlockSpec((8, OUT_PAD), lambda i, j: (0, 0)),   # bias/scale/shift
            ],
            out_specs=pl.BlockSpec((1, TILE_V, OUT_PAD), lambda i, j: (i, 0, 0)),
            scratch_shapes=[pltpu.VMEM((TILE_V, F), jnp.float32)],
        ),
        compiler_params=pltpu.CompilerParams(
            dimension_semantics=("parallel", "arbitrary"),
            vmem_limit_bytes=vmem_limit,
        ),
        cost_estimate=pl.CostEstimate(flops=flops, transcendentals=0,
                                      bytes_accessed=bytes_accessed),
    )(view_features.astype(jnp.float32), w_p, packed)

    out = out.reshape(n_vtiles * TILE_V, OUT_PAD)
    return out[:V, :out_features]


# ----------------------------------------------------------------------------
# Deterministic synthetic parameters + pure-JAX reference.
# ----------------------------------------------------------------------------
def init_params(key, in_features, out_features):
    k_w, k_b, k_g, k_be, k_mu, k_var = jax.random.split(key, 6)
    bound = float(in_features) ** -0.5
    w = jax.random.uniform(k_w, (in_features, out_features), jnp.float32, -bound, bound)
    b = jax.random.uniform(k_b, (1, out_features), jnp.float32, -bound, bound)
    gamma = jax.random.uniform(k_g, (1, out_features), jnp.float32, 0.5, 1.5)
    beta = jax.random.uniform(k_be, (1, out_features), jnp.float32, -0.1, 0.1)
    mean = jax.random.uniform(k_mu, (1, out_features), jnp.float32, -0.1, 0.1)
    var = jax.random.uniform(k_var, (1, out_features), jnp.float32, 0.5, 1.5)
    return (w, b, gamma, beta, mean, var)


def reference_forward(view_features, params):
    w, b, gamma, beta, mean, var = params
    patch = jnp.max(view_features.astype(jnp.float32), axis=1)   # (V, F)
    h = jax.nn.relu(patch @ w + b)
    inv = jax.lax.rsqrt(var + BN_EPS)
    return (h - mean) * inv * gamma + beta


if __name__ == "__main__":
    key = jax.random.PRNGKey(0)
    # V views, B patches per view, F = resnext50 feature width, small output size.
    V, B, F, OUT = 4, 2, 2048, 32
    k_feat, k_p = jax.random.split(key)

    # TODO(synk): pretrained ResNeXt50-32x4d backbone is not reproducible offline;
    # synthetic per-view features stand in for feature_extractor(v).view(B, 2048).
    view_features = jax.random.normal(k_feat, (V, B, F), jnp.float32)

    params = init_params(k_p, F, OUT)

    out = wsinet_forward(view_features, params, out_features=OUT)
    out = jax.block_until_ready(out)

    ref = reference_forward(view_features, params)
    assert out.shape == (V, OUT), out.shape
    # NOTE: matmul runs bf16 x bf16 -> f32 on the MXU (reference is pure f32),
    # hence the relaxed tolerance; max-reduce itself is exact f32.
    assert jnp.allclose(out, ref, atol=5e-2, rtol=5e-2), float(jnp.max(jnp.abs(out - ref)))

    print("KERNEL_OK")
</pallas_src>

<mosaic_0001>
module attributes {stable_mosaic.version = 11 : i64} {
  func.func @wsinet_head_kernel(%arg0: i32, %arg1: i32, %arg2: memref<2x2x2048xf32, #tpu.memory_space<vmem>>, %arg3: memref<2048x128xbf16, #tpu.memory_space<vmem>>, %arg4: memref<8x128xf32, #tpu.memory_space<vmem>>, %arg5: memref<1x2x128xf32, #tpu.memory_space<vmem>>, %arg6: memref<2x2048xf32, #tpu.memory_space<vmem>>) attributes {dimension_semantics = [#tpu.dimension_semantics<parallel>, #tpu.dimension_semantics<arbitrary>], iteration_bounds = array<i64: 2, 1>, scalar_prefetch = 0 : i64, scratch_operands = 1 : i64, tpu.core_type = #tpu.core_type<tc>, window_params = [{transform_indices = @transform_0, window_bounds = array<i64: 2, 2, 2048>}, {pipeline_mode = #tpu.pipeline_mode<synchronous>, transform_indices = @transform_1, window_bounds = array<i64: 2048, 128>}, {pipeline_mode = #tpu.pipeline_mode<synchronous>, transform_indices = @transform_2, window_bounds = array<i64: 8, 128>}, {transform_indices = @transform_3, window_bounds = array<i64: 1, 2, 128>}]} {
    %c0 = arith.constant 0 : index
    %c0_0 = arith.constant 0 : index
    %c0_1 = arith.constant 0 : index
    %0 = vector.load %arg2[%c0, %c0_0, %c0_1] : memref<2x2x2048xf32, #tpu.memory_space<vmem>>, vector<2x2x2048xf32>
    %cst = arith.constant dense<0xFF800000> : vector<2x2048xf32>
    %1 = vector.multi_reduction <maximumf>, %0, %cst [1] : vector<2x2x2048xf32> to vector<2x2048xf32>
    %c0_i32 = arith.constant 0 : i32
    %2 = arith.cmpi eq, %arg1, %c0_i32 : i32
    %3 = arith.extui %2 : i1 to i32
    %c0_i32_2 = arith.constant 0 : i32
    %4 = arith.cmpi ne, %3, %c0_i32_2 : i32
    scf.if %4 {
      %c0_7 = arith.constant 0 : index
      %c0_8 = arith.constant 0 : index
      %11 = vector.load %arg6[%c0_7, %c0_8] : memref<2x2048xf32, #tpu.memory_space<vmem>>, vector<2x2048xf32>
      tpu.vector_store %arg6[%c0_7, %c0_8], %1 {strides = array<i32>} : memref<2x2048xf32, #tpu.memory_space<vmem>>, vector<2x2048xf32>,
    } else {
    }
    %c0_i32_3 = arith.constant 0 : i32
    %5 = arith.cmpi sgt, %arg1, %c0_i32_3 : i32
    %6 = arith.extui %5 : i1 to i32
    %c0_i32_4 = arith.constant 0 : i32
    %7 = arith.cmpi ne, %6, %c0_i32_4 : i32
    scf.if %7 {
      %c0_7 = arith.constant 0 : index
      %c0_8 = arith.constant 0 : index
      %11 = vector.load %arg6[%c0_7, %c0_8] : memref<2x2048xf32, #tpu.memory_space<vmem>>, vector<2x2048xf32>
      %12 = arith.maximumf %11, %1 : vector<2x2048xf32>
      %c0_9 = arith.constant 0 : index
      %c0_10 = arith.constant 0 : index
      %13 = vector.load %arg6[%c0_9, %c0_10] : memref<2x2048xf32, #tpu.memory_space<vmem>>, vector<2x2048xf32>
      tpu.vector_store %arg6[%c0_9, %c0_10], %12 {strides = array<i32>} : memref<2x2048xf32, #tpu.memory_space<vmem>>, vector<2x2048xf32>,
    } else {
    }
    %c0_i32_5 = arith.constant 0 : i32
    %8 = arith.cmpi eq, %arg1, %c0_i32_5 : i32
    %9 = arith.extui %8 : i1 to i32
    %c0_i32_6 = arith.constant 0 : i32
    %10 = arith.cmpi ne, %9, %c0_i32_6 : i32
    scf.if %10 {
      %c0_7 = arith.constant 0 : index
      %c0_8 = arith.constant 0 : index
      %11 = vector.load %arg6[%c0_7, %c0_8] : memref<2x2048xf32, #tpu.memory_space<vmem>>, vector<2x2048xf32>
      %12 = arith.truncf %11 : vector<2x2048xf32> to vector<2x2048xbf16>
      %c0_9 = arith.constant 0 : index
      %c0_10 = arith.constant 0 : index
      %13 = vector.load %arg4[%c0_9, %c0_10] : memref<8x128xf32, #tpu.memory_space<vmem>>, vector<8x128xf32>
      %14 = vector.extract_strided_slice %13 {offsets = [0, 0], sizes = [1, 128], strides = [1, 1]} : vector<8x128xf32> to vector<1x128xf32>
      %15 = vector.extract_strided_slice %13 {offsets = [1, 0], sizes = [1, 128], strides = [1, 1]} : vector<8x128xf32> to vector<1x128xf32>
      %16 = vector.extract_strided_slice %13 {offsets = [2, 0], sizes = [1, 128], strides = [1, 1]} : vector<8x128xf32> to vector<1x128xf32>
      %c0_11 = arith.constant 0 : index
      %c0_12 = arith.constant 0 : index
      %17 = vector.load %arg3[%c0_11, %c0_12] : memref<2048x128xbf16, #tpu.memory_space<vmem>>, vector<2048x128xbf16>
      %cst_13 = arith.constant dense<0.000000e+00> : vector<2x128xf32>
      %18 = tpu.matmul %12, %17, %cst_13 {dimension_numbers = #tpu.dot_dimension_numbers<[1], [0], [0], [1], [0, 0, 1, 1], [], []>} : vector<2x2048xbf16>, vector<2048x128xbf16>, vector<2x128xf32> -> vector<2x128xf32>
      %19 = vector.broadcast %14 : vector<1x128xf32> to vector<2x128xf32>
      %20 = arith.addf %18, %19 : vector<2x128xf32>
      %cst_14 = arith.constant 0.000000e+00 : f32
      %21 = vector.broadcast %cst_14 : f32 to vector<2x128xf32>
      %22 = arith.maximumf %20, %21 : vector<2x128xf32>
      %23 = vector.broadcast %15 : vector<1x128xf32> to vector<2x128xf32>
      %24 = arith.mulf %22, %23 : vector<2x128xf32>
      %25 = vector.broadcast %16 : vector<1x128xf32> to vector<2x128xf32>
      %26 = arith.addf %24, %25 : vector<2x128xf32>
      %c0_15 = arith.constant 0 : index
      %c0_16 = arith.constant 0 : index
      %c0_17 = arith.constant 0 : index
      %27 = vector.load %arg5[%c0_15, %c0_16, %c0_17] : memref<1x2x128xf32, #tpu.memory_space<vmem>>, vector<1x2x128xf32>
      %28 = vector.shape_cast %27 : vector<1x2x128xf32> to vector<2x128xf32>
      %29 = vector.shape_cast %26 : vector<2x128xf32> to vector<1x2x128xf32>
      tpu.vector_store %arg5[%c0_15, %c0_16, %c0_17], %29 {strides = array<i32>} : memref<1x2x128xf32, #tpu.memory_space<vmem>>, vector<1x2x128xf32>,
    } else {
    }
    return
  }
  func.func @transform_0(%arg0: i32, %arg1: i32) -> (i32, i32, i32) {
    %c0_i32 = arith.constant 0 : i32
    %c0_i32_0 = arith.constant 0 : i32
    return %arg0, %arg1, %c0_i32 : i32, i32, i32
  }
  func.func @transform_1(%arg0: i32, %arg1: i32) -> (i32, i32) {
    %c0_i32 = arith.constant 0 : i32
    %c0_i32_0 = arith.constant 0 : i32
    %c0_i32_1 = arith.constant 0 : i32
    return %c0_i32, %c0_i32_0 : i32, i32
  }
  func.func @transform_2(%arg0: i32, %arg1: i32) -> (i32, i32) {
    %c0_i32 = arith.constant 0 : i32
    %c0_i32_0 = arith.constant 0 : i32
    %c0_i32_1 = arith.constant 0 : i32
    return %c0_i32, %c0_i32_0 : i32, i32
  }
  func.func @transform_3(%arg0: i32, %arg1: i32) -> (i32, i32, i32) {
    %c0_i32 = arith.constant 0 : i32
    %c0_i32_0 = arith.constant 0 : i32
    %c0_i32_1 = arith.constant 0 : i32
    return %arg0, %c0_i32, %c0_i32_0 : i32, i32, i32
  }
}

</mosaic_0001>

<bundles_post_ra>
// kernel: wsinet_forward.1
= control target key start
LH: loop header
LB: loop body
LE: loop exit
PB: predicated region body
PF: predicated region fallthrough
CT: control target
= control target key end

     0   :  { %8 = vsyncpa [#allocation4], 0  ;;  %s3824_s0 = inlined_call_operand.vmem [shape: f32[4,2,2048], index: 0, kind: input, shape index: {}]   ;;  %s3825_s1 = inlined_call_operand.vmem [shape: bf16[2048,128], index: 1, kind: input, shape index: {}]   ;;  %s3826_s2 = inlined_call_operand.vmem [shape: f32[8,128], index: 2, kind: input, shape index: {}]   ;;  %s3827_s3 = inlined_call_operand.hbm [shape: f32[2,2,128], index: 3, kind: output, shape index: {}]  }
   0x1   :  { %10 = vsyncpa [#allocation4 + $0x1], 0  ;;  %s3220_s12 = smov 0   ;;  %s3222_s13 = smov 0  }
   0x2   :  { %s3224_s14 = smov 0   ;;  %s3226_s15 = smov 0  }
   0x3   :  { %s3228_s16 = smov 0   ;;  %s3230_s17 = smov 0  }
   0x4 LB: > { %s2608_s18 = sadd.s32 4294967295, %s3196_s17   ;;  %s2609_s19 = sadd.s32 4294967294, %s3196_s17   ;;  %s3196_s17 = sphi %s3230_s17, %s16_s17   ;;  %s3192_s16 = sphi %s3228_s16, %s3834_s16   ;;  %s3188_s15 = sphi %s3226_s15, %s3833_s15   ;;  %s3184_s14 = sphi %s3224_s14, %s3832_s14   ;;  %s3180_s13 = sphi %s3222_s13, %s3831_s13   ;;  %s3176_s12 = sphi %s3220_s12, %s3830_s12  }
   0x5   : > { %s28_s20 = sadd.s32 1, %s3192_s16  ;;  %s105_s21 = sadd.s32 1, %s3184_s14 }
   0x6   : > { %p30_p0 = scmp.ge.s32.totalorder %s28_s20, 2  ;;  %p115_p1 = scmp.ne.s32.totalorder %s3184_s14, %s3180_s13 }
   0x7   : > { %p116_p2 = scmp.eq.s32.totalorder %s2608_s18, 1  ;;  %p121_p3 = scmp.ne.s32.totalorder %s3180_s13, %s3176_s12 }
   0x8   : > { %s3836_s20 = smov (%p30_p0, %s28_s20), 0  ;;  %p122_p5 = scmp.eq.s32.totalorder %s2609_s19, 1 }
   0x9   : > { %p3260_p4 = por %p116_p2, %p115_p1  ;;  %s102_s23 = ssub.s32 %s3192_s16, %s3836_s20 }
   0xa   : > { %p2612_p6 = scmp.ge.s32.totalorder %s3196_s17, 1  ;;  %p103_p7 = scmp.eq.s32.totalorder %s102_s23, 0 }
   0xb   : > { %p3267_p8 = por %p122_p5, %p121_p3  ;;  %p160_p9 = scmp.lt.s32.totalorder %s3196_s17, 3 }
   0xc   : > { %s3273_s25 = scalar_select %p103_p7, %s3184_s14, %s105_s21  }
   0xd   : > { %p161_p10 = pnand %p2612_p6, %p160_p9 }
   0xe   : > { %v2982_v0 = vld [vmem:[%s3825_s1 + $0x40] sm:$0xff] (!%p161_p10)   ;;  %v2986_v4 = vld [vmem:[%s3825_s1 + $0x48] sm:$0xff] (!%p161_p10)   ;;  %v2990_v8 = vld [vmem:[%s3825_s1 + $0x50] sm:$0xff] (!%p161_p10)   ;;  %s2614_s21 = sshll.u32 (!%p161_p10), %s3188_s15, 1  ;;  %v221_v30 = vlaneseq (!%p161_p10)  ;;  %v3198_v35 = vmov (!%p161_p10), 1983009808  }
   0xf   : > { %164 = sbr.rel (%p161_p10) target bundleno = 405 (0x195), region = 32  ;;  %v2983_v1 = vld [vmem:[%s3825_s1] sm:$0xff] (!%p161_p10)   ;;  %2750 = vmatprep.subr.bf16.mxu0 (!%p161_p10), %v2982_v0  ;;  %v2987_v5 = vld [vmem:[%s3825_s1 + $0x8] sm:$0xff] (!%p161_p10)   ;;  %v2991_v9 = vld [vmem:[%s3825_s1 + $0x10] sm:$0xff] (!%p161_p10)   ;;  %p190_p11 = scmp.lt.s32.totalorder (!%p161_p10), %s2614_s21, 3  ;;  %v219_v36 = vunpack.c.l.s4 (!%p161_p10), %v3198_v35  ;;  %vm385_vm0 = vcmask (!%p161_p10), 1041408  }
  0x10   : > { %v2984_v2 = vld [vmem:[%s3825_s1 + $0xc0] sm:$0xff] (!%p161_p10)   ;;  %2751 = vmatpush3.bf16.msra.mxu0 (!%p161_p10), %v2983_v1  ;;  %v2988_v6 = vld [vmem:[%s3825_s1 + $0xc8] sm:$0xff] (!%p161_p10)   ;;  %v2992_v10 = vld [vmem:[%s3825_s1 + $0xd0] sm:$0xff] (!%p161_p10)   ;;  %v3379_v37 = vshrl.u32 (!%p161_p10), %v221_v30, 7  ;;  %vm787_vm1 = vcmask (!%p161_p10), 1041409   ;;  %vm789_vm2 = vcmask (!%p161_p10), 1043459  }
  0x11   : > { %v2985_v3 = vld [vmem:[%s3825_s1 + $0x80] sm:$0xff] (!%p161_p10)   ;;  %2772 = vmatprep.subr.bf16.mxu1 (!%p161_p10), %v2984_v2  ;;  %2752 = vmatprep.subr.bf16.mxu0 (!%p161_p10), %v2986_v4  ;;  %v2989_v7 = vld [vmem:[%s3825_s1 + $0x88] sm:$0xff] (!%p161_p10)   ;;  %v2993_v11 = vld [vmem:[%s3825_s1 + $0x90] sm:$0xff] (!%p161_p10)   ;;  %v220_v40 = vunpack.c.0.s8 (!%p161_p10), %v219_v36  ;;  %vm791_vm3 = vcmask (!%p161_p10), 1045509   ;;  %vm793_vm4 = vcmask (!%p161_p10), 1047559   ;;  %s186_s26 = sand.u32 (!%p161_p10), 1, %s3180_s13  }
  0x12   : > { %2773 = vmatpush3.bf16.msra.mxu1 (!%p161_p10), %v2985_v3  ;;  %v2994_v12 = vld [vmem:[%s3825_s1 + $0x58] sm:$0xff] (!%p161_p10)   ;;  %v2998_v16 = vld [vmem:[%s3825_s1 + $0x60] sm:$0xff] (!%p161_p10)   ;;  %v3002_v20 = vld [vmem:[%s3825_s1 + $0x68] sm:$0xff] (!%p161_p10)   ;;  %s2613_s27 = sshll.u32 (!%p161_p10), %s186_s26, 1  ;;  %s2746_s28 = sshll.u32 (!%p161_p10), %s3188_s15, 5 }
  0x13   : > { %2774 = vmatprep.subr.bf16.mxu1 (!%p161_p10), %v2988_v6  ;;  %v2995_v13 = vld [vmem:[%s3825_s1 + $0x18] sm:$0xff] (!%p161_p10)   ;;  %v2999_v17 = vld [vmem:[%s3825_s1 + $0x20] sm:$0xff] (!%p161_p10)   ;;  %v3003_v21 = vld [vmem:[%s3825_s1 + $0x28] sm:$0xff] (!%p161_p10)   ;;  %v3388_v43 = vsub.s32 (!%p161_p10), %v220_v40, %v3379_v37  ;;  %s188_s29 = scalar_lea.vmem (!%p161_p10), [#allocation3], %s2613_s27  ;;  %s3777_s5 = scalar_lea.hbm (!%p161_p10), %s3827_s3, %s2746_s28 }
  0x14   : > { %2753 = vmatpush3.bf16.msra.mxu0 (!%p161_p10), %v2987_v5  ;;  %v2996_v14 = vld [vmem:[%s3825_s1 + $0xd8] sm:$0xff] (!%p161_p10)   ;;  %v3000_v18 = vld [vmem:[%s3825_s1 + $0xe0] sm:$0xff] (!%p161_p10)   ;;  %v3004_v22 = vld [vmem:[%s3825_s1 + $0xe8] sm:$0xff] (!%p161_p10)   ;;  %s2519_s6 = scalar_lea.sflag (!%p161_p10), [#allocation4], %s186_s26  ;;  %s3199_s15 = smov (!%p161_p10), [#allocation3]  }
  0x15   : > { %2754 = vmatprep.subr.bf16.mxu0 (!%p161_p10), %v2990_v8  ;;  %v2997_v15 = vld [vmem:[%s3825_s1 + $0x98] sm:$0xff] (!%p161_p10)   ;;  %v3001_v19 = vld [vmem:[%s3825_s1 + $0xa0] sm:$0xff] (!%p161_p10)   ;;  %v3005_v23 = vld [vmem:[%s3825_s1 + $0xa8] sm:$0xff] (!%p161_p10)   ;;  %s3122_s8 = sshll.u32 (!%p161_p10), %s3199_s15, 4  ;;  %s3123_s8 = int_to_ptr.vmem [resolvable:$false] %s3122_s8 }
  0x16   : > { %2775 = vmatpush3.bf16.msra.mxu1 %v2989_v7  ;;  %s3838_s21 = smov (!%p190_p11, %s2614_s21), 3  ;;  %v3006_v24 = vld [vmem:[%s3825_s1 + $0x70] sm:$0xff]   ;;  %v3010_v28 = vld [vmem:[%s3825_s1 + $0x78] sm:$0xff]   ;;  %v3016_v38 = vld [vmem:[%s3825_s1 + $0x140] sm:$0xff]   ;;  %s3124_s9 = scalar_lea.vmem %s3123_s8, 64 }
  0x17   : > { %2776 = vmatprep.subr.bf16.mxu1 %v2992_v10  ;;  %v3007_v25 = vld [vmem:[%s3825_s1 + $0x30] sm:$0xff]   ;;  %s2749_s4 = sshll.u32 %s3838_s21, 5  ;;  %v3011_v29 = vld [vmem:[%s3825_s1 + $0x38] sm:$0xff]   ;;  %v3018_v42 = vld [vmem:[%s3825_s1 + $0x1c0] sm:$0xff]  }
  0x18   : > { %2755 = vmatpush3.bf16.msra.mxu0 %v2991_v9  ;;  %v3008_v26 = vld [vmem:[%s3825_s1 + $0xf0] sm:$0xff]   ;;  %s3369_s19 = scalar_lea.vmem %s3824_s0, %s2749_s4  ;;  %v3012_v31 = vld [vmem:[%s3825_s1 + $0xf8] sm:$0xff]  }
  0x19   : > { %2756 = vmatprep.subr.bf16.mxu0 %v2994_v12  ;;  %v3009_v27 = vld [vmem:[%s3825_s1 + $0xb0] sm:$0xff]   ;;  %v3013_v32 = vld [vmem:[%s3825_s1 + $0xb8] sm:$0xff]   ;;  %v201_v33 = vld [vmem:[%s3369_s19] sm:$0xff] }
  0x1a   : > { %2777 = vmatpush3.bf16.msra.mxu1 %v2993_v11  ;;  %v205_v34 = vld [vmem:[%s3369_s19 + $0x20] sm:$0xff]  ;;  %v217_v39 = vcombine.high %v201_v33, %v201_v33  ;;  %v224_v44 = vrot.slane %v201_v33, %v3388_v43 }
  0x1b   : > { %2778 = vmatprep.subr.bf16.mxu1 %v2996_v14  ;;  %v285_v41 = vcombine.high %v205_v34, %v205_v34  ;;  %v292_v46 = vrot.slane %v205_v34, %v3388_v43 }
  0x1c   : > { %2757 = vmatpush3.bf16.msra.mxu0 %v2995_v13  ;;  %v231_v45 = vrot.slane %v217_v39, %v3388_v43  ;;  %v232_v48 = vcombine.high %v224_v44, %v224_v44  ;;  %v386_v52 = vsel %vm385_vm0, %v224_v44, -inf }
  0x1d   : > { %2758 = vmatprep.subr.bf16.mxu0 %v2998_v16  ;;  %v299_v47 = vrot.slane %v285_v41, %v3388_v43  ;;  %v300_v50 = vcombine.high %v292_v46, %v292_v46  ;;  %v498_v54 = vsel %vm385_vm0, %v292_v46, -inf  ;;  %v387_v56 = vrot.slane %v386_v52, 4 }
  0x1e   : > { %2779 = vmatpush3.bf16.msra.mxu1 %v2997_v15  ;;  %v233_v49 = vcombine.high %v231_v45, %v231_v45  ;;  %v400_v53 = vsel %vm385_vm0, %v231_v45, -inf  ;;  %v393_v57 = vsel %vm385_vm0, %v232_v48, -inf  ;;  %v499_v62 = vrot.slane %v498_v54, 4 }
  0x1f   : > { %2780 = vmatprep.subr.bf16.mxu1 %v3000_v18  ;;  %v301_v51 = vcombine.high %v299_v47, %v299_v47  ;;  %v512_v55 = vsel %vm385_vm0, %v299_v47, -inf  ;;  %v401_v58 = vrot.slane %v400_v53, 4  ;;  %v394_v60 = vrot.slane %v393_v57, 4 }
  0x20   : > { %2759 = vmatpush3.bf16.msra.mxu0 %v2999_v17  ;;  %v407_v59 = vsel %vm385_vm0, %v233_v49, -inf  ;;  %v505_v63 = vsel %vm385_vm0, %v300_v50, -inf  ;;  %v388_v0 = vmax.f32 %v386_v52, %v387_v56  ;;  %v513_v3 = vrot.slane %v512_v55, 4 }
  0x21   : > { %2760 = vmatprep.subr.bf16.mxu0 %v3002_v20  ;;  %v408_v61 = vrot.slane %v407_v59, 4  ;;  %v402_v1 = vmax.f32 %v400_v53, %v401_v58  ;;  %v506_v2 = vrot.slane %v505_v63, 4  ;;  %v395_v4 = vmax.f32 %v393_v57, %v394_v60  ;;  %v202_v57 = vld [vmem:[%s3369_s19 + $0x8] sm:$0xff] }
  0x22   : > { %2781 = vmatpush3.bf16.msra.mxu1 %v3001_v19  ;;  %v500_v6 = vmax.f32 %v498_v54, %v499_v62  ;;  %v519_v7 = vsel %vm385_vm0, %v301_v51, -inf  ;;  %v389_v8 = vrot.slane %v388_v0, 2  ;;  %v514_v11 = vmax.f32 %v512_v55, %v513_v3 }
  0x23   : > { %2782 = vmatprep.subr.bf16.mxu1 %v3004_v22  ;;  %v409_v5 = vmax.f32 %v407_v59, %v408_v61  ;;  %v403_v9 = vrot.slane %v402_v1, 2  ;;  %v507_v10 = vmax.f32 %v505_v63, %v506_v2  ;;  %v396_v12 = vrot.slane %v395_v4, 2  ;;  %v206_v59 = vld [vmem:[%s3369_s19 + $0x28] sm:$0xff] }
  0x24   : > { %2761 = vmatpush3.bf16.msra.mxu0 %v3003_v21  ;;  %v501_v14 = vrot.slane %v500_v6, 2  ;;  %v520_v15 = vrot.slane %v519_v7, 4  ;;  %v390_v16 = vmax.f32 %v388_v0, %v389_v8  ;;  %v515_v19 = vrot.slane %v514_v11, 2 }
  0x25   : > { %2762 = vmatprep.subr.bf16.mxu0 %v3006_v24  ;;  %v410_v13 = vrot.slane %v409_v5, 2  ;;  %v404_v17 = vmax.f32 %v402_v1, %v403_v9  ;;  %v508_v18 = vrot.slane %v507_v10, 2  ;;  %v397_v20 = vmax.f32 %v395_v4, %v396_v12 }
  0x26   : > { %2783 = vmatpush3.bf16.msra.mxu1 %v3005_v23  ;;  %v502_v22 = vmax.f32 %v500_v6, %v501_v14  ;;  %v521_v23 = vmax.f32 %v519_v7, %v520_v15  ;;  %v391_v24 = vrot.slane %v390_v16, 1  ;;  %v234_v60 = vcombine.high %v202_v57, %v202_v57 }
  0x27   : > { %2784 = vmatprep.subr.bf16.mxu1 %v3008_v26  ;;  %v411_v21 = vmax.f32 %v409_v5, %v410_v13  ;;  %v509_v26 = vmax.f32 %v507_v10, %v508_v18  ;;  %v241_v61 = vrot.slane %v202_v57, %v3388_v43  ;;  %v302_v63 = vcombine.high %v206_v59, %v206_v59 }
  0x28   : > { %2763 = vmatpush3.bf16.msra.mxu0 %v3007_v25  ;;  %v405_v25 = vrot.slane %v404_v17, 1  ;;  %v503_v30 = vrot.slane %v502_v22, 1  ;;  %v309_v0 = vrot.slane %v206_v59, %v3388_v43  ;;  %v248_v2 = vrot.slane %v234_v60, %v3388_v43 }
  0x29   : > { %2764 = vmatprep.subr.bf16.mxu0 %v3010_v28  ;;  %v398_v28 = vrot.slane %v397_v20, 1  ;;  %v510_v34 = vrot.slane %v509_v26, 1  ;;  %v249_v3 = vcombine.high %v241_v61, %v241_v61  ;;  %v414_v4 = vsel %vm385_vm0, %v241_v61, -inf }
  0x2a   : > { %2785 = vmatpush3.bf16.msra.mxu1 %v3009_v27  ;;  %v516_v27 = vmax.f32 %v514_v11, %v515_v19  ;;  %v406_v33 = vmax.f32 %v404_v17, %v405_v25  ;;  %v504_v39 = vmax.f32 %v502_v22, %v503_v30  ;;  %v316_v6 = vrot.slane %v302_v63, %v3388_v43 }
  0x2b   : > { %2786 = vmatprep.subr.bf16.mxu1 %v3012_v31  ;;  %v522_v31 = vrot.slane %v521_v23, 2  ;;  %v399_v36 = vmax.f32 %v397_v20, %v398_v28  ;;  %v511_v41 = vmax.f32 %v509_v26, %v510_v34  ;;  %v317_v7 = vcombine.high %v309_v0, %v309_v0 }
  0x2c   : > { %2765 = vmatpush3.bf16.msra.mxu0 %v3011_v29  ;;  %v412_v29 = vrot.slane %v411_v21, 1  ;;  %v517_v35 = vrot.slane %v516_v27, 1  ;;  %v415_v8 = vrot.slane %v414_v4, 4  ;;  %v250_v11 = vcombine.high %v248_v2, %v248_v2 }
  0x2d   : > { %2794 = vmatprep.subr.bf16.mxu0 %v3016_v38  ;;  %v523_v40 = vmax.f32 %v521_v23, %v522_v31  ;;  %v714_v47 = vcombine.low %v504_v39, %v511_v41  ;;  %v421_v12 = vsel %vm385_vm0, %v249_v3, -inf  ;;  %v318_v13 = vcombine.high %v316_v6, %v316_v6  ;;  %v3020_v31 = vld [vmem:[%s3825_s1 + $0x148] sm:$0xff]  }
  0x2e   : > { %2787 = vmatpush3.bf16.msra.mxu1 %v3013_v32  ;;  %v392_v32 = vmax.f32 %v390_v16, %v391_v24  ;;  %v413_v38 = vmax.f32 %v411_v21, %v412_v29  ;;  %v416_v14 = vmax.f32 %v414_v4, %v415_v8  ;;  %v422_v15 = vrot.slane %v421_v12, 4  ;;  %v3017_v21 = vld [vmem:[%s3825_s1 + $0x100] sm:$0xff]  }
  0x2f   : > { %2816 = vmatprep.subr.bf16.mxu1 %v3018_v42  ;;  %v518_v42 = vmax.f32 %v516_v27, %v517_v35  ;;  %v524_v44 = vrot.slane %v523_v40, 1  ;;  %v722_v52 = vrot.slane %v714_v47, %v3388_v43  ;;  %v428_v16 = vsel %vm385_vm0, %v248_v2, -inf  ;;  %v3019_v29 = vld [vmem:[%s3825_s1 + $0x180] sm:$0xff]   ;;  %v3023_v47 = vld [vmem:[%s3825_s1 + $0x188] sm:$0xff]   ;;  %v3028_v2 = vld [vmem:[%s3825_s1 + $0x158] sm:$0xff]  }
  0x30   : > { %v646_v45 = vcombine.low %v392_v32, %v399_v36  ;;  %v647_v46 = vcombine.low %v406_v33, %v413_v38  ;;  %v429_v20 = vrot.slane %v428_v16, 4  ;;  %v417_v22 = vrot.slane %v416_v14, 2  ;;  %v3021_v38 = vld [vmem:[%s3825_s1 + $0x108] sm:$0xff]  }
  0x31   : > { %v525_v48 = vmax.f32 %v523_v40, %v524_v44  ;;  %v423_v23 = vmax.f32 %v421_v12, %v422_v15  ;;  %v435_v24 = vsel %vm385_vm0, %v250_v11, -inf  ;;  %v526_v25 = vsel %vm385_vm0, %v309_v0, -inf  ;;  %v3030_v15 = vld [vmem:[%s3825_s1 + $0x1d8] sm:$0xff]  }
  0x32   : > { %v654_v49 = vrot.slane %v646_v45, %v3388_v43  ;;  %v661_v50 = vrot.slane %v647_v46, %v3388_v43  ;;  %v430_v30 = vmax.f32 %v428_v16, %v429_v20  ;;  %v418_v32 = vmax.f32 %v416_v14, %v417_v22 }
  0x33   : > { %v715_v51 = vcombine.low %v518_v42, %v525_v48  ;;  %v424_v33 = vrot.slane %v423_v23, 2  ;;  %v436_v34 = vrot.slane %v435_v24, 4  ;;  %v527_v35 = vrot.slane %v526_v25, 4  ;;  %v3022_v42 = vld [vmem:[%s3825_s1 + $0x1c8] sm:$0xff]   ;;  %v3024_v48 = vld [vmem:[%s3825_s1 + $0x150] sm:$0xff]  }
  0x34   : > { %v662_v54 = vcombine.low %v654_v49, %v661_v50  ;;  %v431_v39 = vrot.slane %v430_v30, 2  ;;  %v533_v40 = vsel %vm385_vm0, %v317_v7, -inf  ;;  %v540_v41 = vsel %vm385_vm0, %v316_v6, -inf }
  0x35   : > { %v729_v53 = vrot.slane %v715_v51, %v3388_v43  ;;  %v425_v44 = vmax.f32 %v423_v23, %v424_v33  ;;  %v437_v45 = vmax.f32 %v435_v24, %v436_v34  ;;  %v528_v46 = vmax.f32 %v526_v25, %v527_v35  ;;  %v3033_v24 = vld [vmem:[%s3825_s1 + $0x120] sm:$0xff]   ;;  %v3036_v33 = vld [vmem:[%s3825_s1 + $0x168] sm:$0xff]  }
  0x36   : > { %v432_v49 = vmax.f32 %v430_v30, %v431_v39  ;;  %v534_v50 = vrot.slane %v533_v40, 4  ;;  %v541_v51 = vrot.slane %v540_v41, 4  ;;  %v3035_v30 = vld [vmem:[%s3825_s1 + $0x1a0] sm:$0xff]   ;;  %v3037_v34 = vld [vmem:[%s3825_s1 + $0x128] sm:$0xff]  }
  0x37   : > { %v730_v55 = vcombine.low %v722_v52, %v729_v53  ;;  %v547_v52 = vsel %vm385_vm0, %v318_v13, -inf  ;;  %v3026_v53 = vld [vmem:[%s3825_s1 + $0x1d0] sm:$0xff]   ;;  %v529_v57 = vrot.slane %v528_v46, 2 }
  0x38   : > { %v433_v59 = vrot.slane %v432_v49, 1  ;;  %v535_v60 = vmax.f32 %v533_v40, %v534_v50  ;;  %v542_v61 = vmax.f32 %v540_v41, %v541_v51  ;;  %v3038_v40 = vld [vmem:[%s3825_s1 + $0x1e8] sm:$0xff]   ;;  %v3044_v51 = vld [vmem:[%s3825_s1 + $0x178] sm:$0xff]  }
  0x39   : > { %v786_v56 = vrot.slane %v730_v55, 7  ;;  %v426_v55 = vrot.slane %v425_v44, 1  ;;  %v530_v0 = vmax.f32 %v528_v46, %v529_v57  ;;  %v3039_v41 = vld [vmem:[%s3825_s1 + $0x1a8] sm:$0xff]  }
  0x3a   : > { %v536_v3 = vrot.slane %v535_v60, 2  ;;  %v543_v4 = vrot.slane %v542_v61, 2  ;;  %v434_v11 = vmax.f32 %v432_v49, %v433_v59  ;;  %v3043_v49 = vld [vmem:[%s3825_s1 + $0x1b0] sm:$0xff]   ;;  %v3045_v59 = vld [vmem:[%s3825_s1 + $0x138] sm:$0xff]  }
  0x3b   : > { %v788_v58 = vsel %vm787_vm1, %v786_v56, %v662_v54  ;;  %v419_v54 = vrot.slane %v418_v32, 1  ;;  %v427_v7 = vmax.f32 %v425_v44, %v426_v55  ;;  %v3040_v44 = vld [vmem:[%s3825_s1 + $0x170] sm:$0xff]  }
  0x3c   : > { %v790_v62 = vsel %vm789_vm2, %v786_v56, %v788_v58  ;;  %v3025_v58 = vld [vmem:[%s3825_s1 + $0x110] sm:$0xff]   ;;  %v537_v12 = vmax.f32 %v535_v60, %v536_v3  ;;  %v544_v13 = vmax.f32 %v542_v61, %v543_v4 }
  0x3d   : > { %v792_v1 = vsel %vm791_vm3, %v786_v56, %v790_v62  ;;  %v548_v62 = vrot.slane %v547_v52, 4  ;;  %v420_v6 = vmax.f32 %v418_v32, %v419_v54  ;;  %v203_v54 = vld [vmem:[%s3369_s19 + $0x10] sm:$0xff] }
  0x3e   : > { %v794_v5 = vsel %vm793_vm4, %v786_v56, %v792_v1  ;;  %v438_v56 = vrot.slane %v437_v45, 2  ;;  %v3027_v1 = vld [vmem:[%s3825_s1 + $0x190] sm:$0xff]   ;;  %v538_v20 = vrot.slane %v537_v12, 1  ;;  %v251_v57 = vcombine.high %v203_v54, %v203_v54 }
  0x3f   : > { %v1064_v9 = vrot.slane %v794_v5, %v3388_v43  ;;  %v1057_v10 = vcombine.high %v794_v5, %v794_v5  ;;  %v549_v5 = vmax.f32 %v547_v52, %v548_v62  ;;  %v663_v23 = vcombine.low %v420_v6, %v427_v7  ;;  %v3046_v52 = vld [vmem:[%s3825_s1 + $0x1f8] sm:$0xff]  }
  0x40   : > { %v439_v63 = vmax.f32 %v437_v45, %v438_v56  ;;  %v539_v25 = vmax.f32 %v537_v12, %v538_v20  ;;  %v3041_v45 = vld [vmem:[%s3825_s1 + $0x130] sm:$0xff]  }
  0x41   : > { %v1072_v17 = vcombine.high %v1064_v9, %v1064_v9  ;;  %v1141_v18 = vpack.c.bf16 %v1064_v9, %v1064_v9  ;;  %v1071_v19 = vrot.slane %v1057_v10, %v3388_v43  ;;  %v531_v9 = vrot.slane %v530_v0, 1  ;;  %v3029_v10 = vld [vmem:[%s3825_s1 + $0x118] sm:$0xff]   ;;  %v207_v56 = vld [vmem:[%s3369_s19 + $0x30] sm:$0xff] }
  0x42   : > { %v440_v8 = vrot.slane %v439_v63, 1  ;;  %v550_v14 = vrot.slane %v549_v5, 2  ;;  %v671_v35 = vrot.slane %v663_v23, %v3388_v43  ;;  %v319_v61 = vcombine.high %v207_v56, %v207_v56 }
  0x43   : > { %v1142_v26 = vpack.c.bf16 %v1072_v17, %v1072_v17  ;;  %v1073_v27 = vcombine.high %v1071_v19, %v1071_v19  ;;  %v1143_v28 = vpack.c.bf16 %v1071_v19, %v1071_v19  ;;  %v3031_v17 = vld [vmem:[%s3825_s1 + $0x198] sm:$0xff]   ;;  %v532_v19 = vmax.f32 %v530_v0, %v531_v9  ;;  %v3050_v0 = vld [vmem:[%s3825_s1 + $0x240] sm:$0xff]  }
  0x44   : > { %v441_v16 = vmax.f32 %v439_v63, %v440_v8  ;;  %v551_v22 = vmax.f32 %v549_v5, %v550_v14  ;;  %v326_v62 = vrot.slane %v207_v56, %v3388_v43  ;;  %v3049_v5 = vld [vmem:[%s3825_s1 + $0x1b8] sm:$0xff]   ;;  %v333_v7 = vrot.slane %v319_v61, %v3388_v43  ;;  %v3052_v9 = vld [vmem:[%s3825_s1 + $0x2c0] sm:$0xff]  }
  0x45   : > { %2218 = vmatprep.mubr.bf16.mxu0 %v1142_v26  ;;  %v1144_v36 = vpack.c.bf16 %v1073_v27, %v1073_v27  ;;  %v731_v32 = vcombine.low %v532_v19, %v539_v25 }
  0x46   : > { %2219 = vmatmul.mubr.bf16.vlgmr.msra.gmra.mrb[0].mxu0 %v1141_v18  ;;  %v3032_v18 = vld [vmem:[%s3825_s1 + $0x160] sm:$0xff]   ;;  %v552_v27 = vrot.slane %v551_v22, 1  ;;  %v334_v8 = vcombine.high %v326_v62, %v326_v62 }
  0x47   : > { %2795 = vmatpush3.bf16.msra.mxu0 %v3017_v21  ;;  %2258 = vmatprep.mubr.bf16.mxu1 %v1144_v36  ;;  %v545_v21 = vrot.slane %v544_v13, 1  ;;  %v739_v39 = vrot.slane %v731_v32, %v3388_v43 }
  0x48   : > { %2259 = vmatmul.mubr.bf16.vlgmr.msra.gmra.mrb[0].mxu1 %v1143_v28  ;;  %2796 = vmatprep.subr.bf16.mxu0 %v3020_v31  ;;  %v664_v28 = vcombine.low %v434_v11, %v441_v16  ;;  %v553_v31 = vmax.f32 %v551_v22, %v552_v27 }
  0x49   : > { %2817 = vmatpush3.bf16.msra.mxu1 %v3019_v29  ;;  %v546_v26 = vmax.f32 %v544_v13, %v545_v21  ;;  %v3034_v29 = vld [vmem:[%s3825_s1 + $0x1e0] sm:$0xff]  }
  0x4a   : > { %2818 = vmatprep.subr.bf16.mxu1 %v3022_v42  ;;  %v678_v36 = vrot.slane %v664_v28, %v3388_v43 }
  0x4b   : > { %2797 = vmatpush3.bf16.msra.mxu0 %v3021_v38  ;;  %v732_v38 = vcombine.low %v546_v26, %v553_v31  ;;  %v3054_v26 = vld [vmem:[%s3825_s1 + $0x248] sm:$0xff]   ;;  %v554_v31 = vsel %vm385_vm0, %v326_v62, -inf }
  0x4c   : > { %2798 = vmatprep.subr.bf16.mxu0 %v3024_v48  ;;  %v679_v46 = vcombine.low %v671_v35, %v678_v36  ;;  %v3042_v48 = vld [vmem:[%s3825_s1 + $0x1f0] sm:$0xff]   ;;  %v555_v36 = vrot.slane %v554_v31, 4 }
  0x4d   : > { %2819 = vmatpush3.bf16.msra.mxu1 %v3023_v47  ;;  %v746_v42 = vrot.slane %v732_v38, %v3388_v43  ;;  %v561_v38 = vsel %vm385_vm0, %v334_v8, -inf }
  0x4e   : > { %2820 = vmatprep.subr.bf16.mxu1 %v3026_v53 }
  0x4f   : > { %2799 = vmatpush3.bf16.msra.mxu0 %v3025_v58  ;;  %v747_v47 = vcombine.low %v739_v39, %v746_v42  ;;  %v258_v58 = vrot.slane %v203_v54, %v3388_v43  ;;  %v3056_v39 = vld [vmem:[%s3825_s1 + $0x2c8] sm:$0xff]  }
  0x50   : > { %2800 = vmatprep.subr.bf16.mxu0 %v3028_v2 }
  0x51   : > { %2821 = vmatpush3.bf16.msra.mxu1 %v3027_v1  ;;  %v797_v50 = vrot.slane %v747_v47, 7  ;;  %v265_v1 = vrot.slane %v251_v57, %v3388_v43  ;;  %v266_v2 = vcombine.high %v258_v58, %v258_v58  ;;  %v442_v3 = vsel %vm385_vm0, %v258_v58, -inf }
  0x52   : > { %2822 = vmatprep.subr.bf16.mxu1 %v3030_v15  ;;  %v443_v11 = vrot.slane %v442_v3, 4  ;;  %v556_v47 = vmax.f32 %v554_v31, %v555_v36 }
  0x53   : > { %2801 = vmatpush3.bf16.msra.mxu0 %v3029_v10  ;;  %v798_v53 = vsel %vm787_vm1, %v797_v50, %v679_v46  ;;  %v267_v10 = vcombine.high %v265_v1, %v265_v1  ;;  %v449_v12 = vsel %vm385_vm0, %v266_v2, -inf  ;;  %v456_v13 = vsel %vm385_vm0, %v265_v1, -inf  ;;  %v3062_v1 = vld [vmem:[%s3825_s1 + $0x258] sm:$0xff]  }
  0x54   : > { %2802 = vmatprep.subr.bf16.mxu0 %v3032_v18  ;;  %v799_v55 = vsel %vm789_vm2, %v797_v50, %v798_v53  ;;  %v3051_v18 = vld [vmem:[%s3825_s1 + $0x200] sm:$0xff]   ;;  %v444_v19 = vmax.f32 %v442_v3, %v443_v11  ;;  %v450_v20 = vrot.slane %v449_v12, 4  ;;  %v457_v21 = vrot.slane %v456_v13, 4 }
  0x55   : > { %2823 = vmatpush3.bf16.msra.mxu1 %v3031_v17  ;;  %v800_v60 = vsel %vm791_vm3, %v797_v50, %v799_v55  ;;  %v335_v17 = vcombine.high %v333_v7, %v333_v7  ;;  %v463_v22 = vsel %vm385_vm0, %v267_v10, -inf  ;;  %v3059_v55 = vld [vmem:[%s3825_s1 + $0x210] sm:$0xff]   ;;  %v557_v57 = vrot.slane %v556_v47, 2  ;;  %v3063_v10 = vld [vmem:[%s3825_s1 + $0x218] sm:$0xff]  }
  0x56   : > { %2824 = vmatprep.subr.bf16.mxu1 %v3034_v29  ;;  %v801_v63 = vsel %vm793_vm4, %v797_v50, %v800_v60  ;;  %v464_v27 = vrot.slane %v463_v22, 4  ;;  %v445_v28 = vrot.slane %v444_v19, 2  ;;  %v451_v29 = vmax.f32 %v449_v12, %v450_v20  ;;  %v3058_v50 = vld [vmem:[%s3825_s1 + $0x250] sm:$0xff]  }
  0x57   : > { %2803 = vmatpush3.bf16.msra.mxu0 %v3033_v24  ;;  %v1081_v4 = vrot.slane %v801_v63, %v3388_v43  ;;  %v1074_v6 = vcombine.high %v801_v63, %v801_v63  ;;  %v3060_v60 = vld [vmem:[%s3825_s1 + $0x2d0] sm:$0xff]   ;;  %v558_v3 = vmax.f32 %v556_v47, %v557_v57  ;;  %v204_v57 = vld [vmem:[%s3369_s19 + $0x18] sm:$0xff] }
  0x58   : > { %2804 = vmatprep.subr.bf16.mxu0 %v3036_v33  ;;  %v3053_v33 = vld [vmem:[%s3825_s1 + $0x280] sm:$0xff]   ;;  %v465_v35 = vmax.f32 %v463_v22, %v464_v27  ;;  %v3076_v47 = vld [vmem:[%s3825_s1 + $0x2f0] sm:$0xff]  }
  0x59   : > { %2825 = vmatpush3.bf16.msra.mxu1 %v3035_v30  ;;  %v1089_v14 = vcombine.high %v1081_v4, %v1081_v4  ;;  %v1145_v15 = vpack.c.bf16 %v1081_v4, %v1081_v4  ;;  %v1088_v16 = vrot.slane %v1074_v6, %v3388_v43  ;;  %v458_v30 = vmax.f32 %v456_v13, %v457_v21  ;;  %v3066_v21 = vld [vmem:[%s3825_s1 + $0x260] sm:$0xff]  }
  0x5a   : > { %2826 = vmatprep.subr.bf16.mxu1 %v3038_v40  ;;  %v446_v40 = vmax.f32 %v444_v19, %v445_v28  ;;  %v466_v46 = vrot.slane %v465_v35, 2  ;;  %v559_v12 = vrot.slane %v558_v3, 1  ;;  %v3068_v27 = vld [vmem:[%s3825_s1 + $0x2e0] sm:$0xff]  }
  0x5b   : > { %2805 = vmatpush3.bf16.msra.mxu0 %v3037_v34  ;;  %v1146_v23 = vpack.c.bf16 %v1089_v14, %v1089_v14  ;;  %v1090_v24 = vcombine.high %v1088_v16, %v1088_v16  ;;  %v1147_v25 = vpack.c.bf16 %v1088_v16, %v1088_v16  ;;  %v3055_v34 = vld [vmem:[%s3825_s1 + $0x208] sm:$0xff]   ;;  %v459_v42 = vrot.slane %v458_v30, 2 }
  0x5c   : > { %2806 = vmatprep.subr.bf16.mxu0 %v3040_v44  ;;  %v562_v44 = vrot.slane %v561_v38, 4  ;;  %v467_v56 = vmax.f32 %v465_v35, %v466_v46 }
  0x5d   : > { %2827 = vmatpush3.bf16.msra.mxu1 %v3039_v41  ;;  %2298 = vmatprep.mubr.bf16.mxu0 %v1146_v23  ;;  %v1148_v32 = vpack.c.bf16 %v1090_v24, %v1090_v24  ;;  %v452_v41 = vrot.slane %v451_v29, 2  ;;  %v460_v53 = vmax.f32 %v458_v30, %v459_v42  ;;  %v3074_v42 = vld [vmem:[%s3825_s1 + $0x270] sm:$0xff]  }
  0x5e   : > { %2828 = vmatprep.subr.bf16.mxu1 %v3042_v48  ;;  %v568_v48 = vsel %vm385_vm0, %v333_v7, -inf  ;;  %v563_v54 = vmax.f32 %v561_v38, %v562_v44  ;;  %v468_v2 = vrot.slane %v467_v56, 1  ;;  %v3073_v44 = vld [vmem:[%s3825_s1 + $0x2a8] sm:$0xff]  }
  0x5f   : > { %2807 = vmatpush3.bf16.msra.mxu0 %v3041_v45  ;;  %2338 = vmatprep.mubr.bf16.mxu1 %v1148_v32  ;;  %v3057_v45 = vld [vmem:[%s3825_s1 + $0x288] sm:$0xff]   ;;  %v569_v58 = vrot.slane %v568_v48, 4  ;;  %v461_v62 = vrot.slane %v460_v53, 1 }
  0x60   : > { %2808 = vmatprep.subr.bf16.mxu0 %v3044_v51  ;;  %v447_v51 = vrot.slane %v446_v40, 1  ;;  %v564_v63 = vrot.slane %v563_v54, 2  ;;  %v469_v11 = vmax.f32 %v467_v56, %v468_v2  ;;  %v3070_v32 = vld [vmem:[%s3825_s1 + $0x268] sm:$0xff]  }
  0x61   : > { %2829 = vmatpush3.bf16.msra.mxu1 %v3043_v49  ;;  %v575_v49 = vsel %vm385_vm0, %v335_v17, -inf  ;;  %v570_v4 = vmax.f32 %v568_v48, %v569_v58  ;;  %v462_v8 = vmax.f32 %v460_v53, %v461_v62  ;;  %v3065_v17 = vld [vmem:[%s3825_s1 + $0x298] sm:$0xff]   ;;  %v3075_v48 = vld [vmem:[%s3825_s1 + $0x230] sm:$0xff]   ;;  %v275_v62 = vrot.slane %v204_v57, %v3388_v43 }
  0x62   : > { %2830 = vmatprep.subr.bf16.mxu1 %v3046_v52  ;;  %v453_v52 = vmax.f32 %v451_v29, %v452_v41  ;;  %v448_v6 = vmax.f32 %v446_v40, %v447_v51  ;;  %v3067_v29 = vld [vmem:[%s3825_s1 + $0x220] sm:$0xff]   ;;  %v3071_v40 = vld [vmem:[%s3825_s1 + $0x228] sm:$0xff]   ;;  %v3077_v51 = vld [vmem:[%s3825_s1 + $0x2b0] sm:$0xff]  }
  0x63   : > { %2809 = vmatpush3.bf16.msra.mxu0 %v3045_v59  ;;  %v576_v59 = vrot.slane %v575_v49, 4  ;;  %v571_v13 = vrot.slane %v570_v4, 2  ;;  %v3080_v53 = vld [vmem:[%s3825_s1 + $0x2f8] sm:$0xff]  }
  0x64   : > { %2838 = vmatprep.subr.bf16.mxu0 %v3050_v0  ;;  %v454_v61 = vrot.slane %v453_v52, 1  ;;  %v3061_v0 = vld [vmem:[%s3825_s1 + $0x290] sm:$0xff]   ;;  %v208_v58 = vld [vmem:[%s3369_s19 + $0x38] sm:$0xff]  ;;  %s2532_s19 = sshll.u32 %s188_s29, 4  ;;  %s3779_s19 = int_to_ptr.vmem [resolvable:$true] %s2532_s19 }
  0x65   : > { %2831 = vmatpush3.bf16.msra.mxu1 %v3049_v5  ;;  %v577_v5 = vmax.f32 %v575_v49, %v576_v59  ;;  %v572_v19 = vmax.f32 %v570_v4, %v571_v13  ;;  %v3086_v4 = vld [vmem:[%s3825_s1 + $0x3c0] sm:$0xff]   ;;  %s3118_s7 = scalar_lea.vmem %s3779_s19, 32  ;;  %p3125_p1 = scmp.lt.s32.totalorder %s3779_s19, %s3123_s8 }
  0x66   : > { %2860 = vmatprep.subr.bf16.mxu1 %v3052_v9  ;;  %2299 = vmatmul.mubr.bf16.vlgmr.msra.gmra.mrb[4].mxu0 %v1145_v15  ;;  %v455_v7 = vmax.f32 %v453_v52, %v454_v61  ;;  %v565_v9 = vmax.f32 %v563_v54, %v564_v63  ;;  %v3064_v15 = vld [vmem:[%s3825_s1 + $0x2d8] sm:$0xff]   ;;  %v268_v61 = vcombine.high %v204_v57, %v204_v57  ;;  %p3119_p12 = scmp.ne.s32.totalorder %s3779_s19, %s3118_s7  ;;  %p3126_p2 = scmp.lt.s32.totalorder %s3124_s9, %s3118_s7 }
  0x67   : > { %2839 = vmatpush3.bf16.msra.mxu0 %v3051_v18  ;;  %v578_v14 = vrot.slane %v577_v5, 2  ;;  %v560_v18 = vmax.f32 %v558_v3, %v559_v12  ;;  %v573_v23 = vrot.slane %v572_v19, 1  ;;  %v336_v63 = vcombine.high %v208_v58, %v208_v58 }
  0x68   : > { %2339 = vmatmul.mubr.bf16.vlgmr.msra.gmra.mrb[4].mxu1 %v1147_v25  ;;  %2840 = vmatprep.subr.bf16.mxu0 %v3054_v26  ;;  %v566_v16 = vrot.slane %v565_v9, 1  ;;  %v680_v25 = vcombine.low %v448_v6, %v455_v7  ;;  %v681_v26 = vcombine.low %v462_v8, %v469_v11  ;;  %v343_v3 = vrot.slane %v208_v58, %v3388_v43  ;;  %p3120_p13 = pnand %p3119_p12, %p3260_p4  ;;  %p3127_p3 = por %p3126_p2, %p3125_p1 }
  0x69   : > { %2861 = vmatpush3.bf16.msra.mxu1 %v3053_v33  ;;  %v579_v20 = vmax.f32 %v577_v5, %v578_v14  ;;  %v574_v30 = vmax.f32 %v572_v19, %v573_v23  ;;  %v3069_v33 = vld [vmem:[%s3825_s1 + $0x2a0] sm:$0xff]   ;;  %v282_v5 = vrot.slane %v268_v61, %v3388_v43  ;;  %v283_v6 = vcombine.high %v275_v62, %v275_v62 }
  0x6a   : > { %2862 = vmatprep.subr.bf16.mxu1 %v3056_v39  ;;  %v567_v22 = vmax.f32 %v565_v9, %v566_v16  ;;  %v695_v35 = vrot.slane %v681_v26, %v3388_v43  ;;  %v3072_v39 = vld [vmem:[%s3825_s1 + $0x2e8] sm:$0xff]   ;;  %v350_v7 = vrot.slane %v336_v63, %v3388_v43  ;;  %v470_v8 = vsel %vm385_vm0, %v275_v62, -inf  ;;  %v3085_v19 = vld [vmem:[%s3825_s1 + $0x300] sm:$0xff]   ;;  %p3121_p0 = pneg %p3120_p13 }
  0x6b   : > { %2841 = vmatpush3.bf16.msra.mxu0 %v3055_v34  ;;  %v580_v24 = vrot.slane %v579_v20, 1  ;;  %v688_v34 = vrot.slane %v680_v25, %v3388_v43  ;;  %v351_v12 = vcombine.high %v343_v3, %v343_v3  ;;  %v284_v13 = vcombine.high %v282_v5, %v282_v5 }
  0x6c   : > { %2842 = vmatprep.subr.bf16.mxu0 %v3058_v50  ;;  %v748_v28 = vcombine.low %v560_v18, %v567_v22  ;;  %v3078_v50 = vld [vmem:[%s3825_s1 + $0x278] sm:$0xff]   ;;  %v352_v14 = vcombine.high %v350_v7, %v350_v7  ;;  %v477_v16 = vsel %vm385_vm0, %v283_v6, -inf  ;;  %v3088_v22 = vld [vmem:[%s3825_s1 + $0x348] sm:$0xff]   ;;  %v582_v26 = vsel %vm385_vm0, %v343_v3, -inf  ;;  %p3128_p5 = pnand %p3127_p3, %p3121_p0 }
  0x6d   : > { %2863 = vmatpush3.bf16.msra.mxu1 %v3057_v45  ;;  %v581_v31 = vmax.f32 %v579_v20, %v580_v24  ;;  %v696_v45 = vcombine.low %v688_v34, %v695_v35  ;;  %v484_v24 = vsel %vm385_vm0, %v282_v5, -inf  ;;  %v491_v25 = vsel %vm385_vm0, %v284_v13, -inf }
  0x6e   : > { %2864 = vmatprep.subr.bf16.mxu1 %v3060_v60  ;;  %v756_v38 = vrot.slane %v748_v28, %v3388_v43  ;;  %v3084_v60 = vld [vmem:[%s3825_s1 + $0x340] sm:$0xff]   ;;  %v583_v34 = vrot.slane %v582_v26, 4  ;;  %v589_v35 = vsel %vm385_vm0, %v351_v12, -inf }
  0x6f   : > { %2843 = vmatpush3.bf16.msra.mxu0 %v3059_v55  ;;  %v749_v36 = vcombine.low %v574_v30, %v581_v31  ;;  %v3079_v55 = vld [vmem:[%s3825_s1 + $0x238] sm:$0xff]   ;;  %v3087_v28 = vld [vmem:[%s3825_s1 + $0x380] sm:$0xff]   ;;  %v485_v30 = vrot.slane %v484_v24, 4  ;;  %v492_v31 = vrot.slane %v491_v25, 4 }
  0x70   : > { %2844 = vmatprep.subr.bf16.mxu0 %v3062_v1  ;;  %v3083_v1 = vld [vmem:[%s3825_s1 + $0x2b8] sm:$0xff]  }
  0x71   : > { %2865 = vmatpush3.bf16.msra.mxu1 %v3061_v0  ;;  %v763_v41 = vrot.slane %v749_v36, %v3388_v43  ;;  %v596_v36 = vsel %vm385_vm0, %v350_v7, -inf }
  0x72   : > { %2866 = vmatprep.subr.bf16.mxu1 %v3064_v15  ;;  %v471_v15 = vrot.slane %v470_v8, 4 }
  0x73   : > { %2845 = vmatpush3.bf16.msra.mxu0 %v3063_v10  ;;  %v764_v46 = vcombine.low %v756_v38, %v763_v41  ;;  %v3089_v38 = vld [vmem:[%s3825_s1 + $0x308] sm:$0xff]   ;;  %v493_v41 = vmax.f32 %v491_v25, %v492_v31 }
  0x74   : > { %2846 = vmatprep.subr.bf16.mxu0 %v3066_v21  ;;  %v478_v21 = vrot.slane %v477_v16, 4  ;;  %v472_v23 = vmax.f32 %v470_v8, %v471_v15  ;;  %v3104_v31 = vld [vmem:[%s3825_s1 + $0x368] sm:$0xff]  }
  0x75   : > { %2867 = vmatpush3.bf16.msra.mxu1 %v3065_v17  ;;  %v804_v49 = vrot.slane %v764_v46, 7  ;;  %v584_v46 = vmax.f32 %v582_v26, %v583_v34  ;;  %v3106_v34 = vld [vmem:[%s3825_s1 + $0x3e8] sm:$0xff]  }
  0x76   : > { %2868 = vmatprep.subr.bf16.mxu1 %v3068_v27 }
  0x77   : > { %2847 = vmatpush3.bf16.msra.mxu0 %v3067_v29  ;;  %v805_v52 = vsel %vm787_vm1, %v804_v49, %v696_v45  ;;  %v479_v29 = vmax.f32 %v477_v16, %v478_v21 }
  0x78   : > { %2848 = vmatprep.subr.bf16.mxu0 %v3070_v32  ;;  %v806_v54 = vsel %vm789_vm2, %v804_v49, %v805_v52  ;;  %v3090_v32 = vld [vmem:[%s3825_s1 + $0x3c8] sm:$0xff]   ;;  %v494_v52 = vrot.slane %v493_v41, 2 }
  0x79   : > { %2869 = vmatpush3.bf16.msra.mxu1 %v3069_v33  ;;  %v807_v56 = vsel %vm791_vm3, %v804_v49, %v806_v54  ;;  %v473_v33 = vrot.slane %v472_v23, 2  ;;  %v3094_v54 = vld [vmem:[%s3825_s1 + $0x3d0] sm:$0xff]  }
  0x7a   : > { %2870 = vmatprep.subr.bf16.mxu1 %v3072_v39  ;;  %v808_v59 = vsel %vm793_vm4, %v804_v49, %v807_v56  ;;  %v480_v39 = vrot.slane %v479_v29, 2  ;;  %v3091_v49 = vld [vmem:[%s3825_s1 + $0x388] sm:$0xff]   ;;  %v585_v56 = vrot.slane %v584_v46, 2  ;;  %v495_v62 = vmax.f32 %v493_v41, %v494_v52  ;;  %v3108_v41 = vld [vmem:[%s3825_s1 + $0x370] sm:$0xff]   ;;  %v3114_v52 = vld [vmem:[%s3825_s1 + $0x3f8] sm:$0xff]  }
  0x7b   : > { %2849 = vmatpush3.bf16.msra.mxu0 %v3071_v40  ;;  %v1098_v0 = vrot.slane %v808_v59, %v3388_v43  ;;  %v1091_v2 = vcombine.high %v808_v59, %v808_v59  ;;  %v486_v40 = vmax.f32 %v484_v24, %v485_v30  ;;  %v474_v45 = vmax.f32 %v472_v23, %v473_v33  ;;  %v3093_v59 = vld [vmem:[%s3825_s1 + $0x310] sm:$0xff]   ;;  %v3102_v24 = vld [vmem:[%s3825_s1 + $0x3e0] sm:$0xff]  }
  0x7c   : > { %2850 = vmatprep.subr.bf16.mxu0 %v3074_v42  ;;  %v590_v42 = vrot.slane %v589_v35, 4  ;;  %v496_v7 = vrot.slane %v495_v62, 1  ;;  %v3103_v33 = vld [vmem:[%s3825_s1 + $0x3a0] sm:$0xff]  }
  0x7d   : > { %2871 = vmatpush3.bf16.msra.mxu1 %v3073_v44  ;;  %v1106_v9 = vcombine.high %v1098_v0, %v1098_v0  ;;  %v1149_v10 = vpack.c.bf16 %v1098_v0, %v1098_v0  ;;  %v1105_v11 = vrot.slane %v1091_v2, %v3388_v43  ;;  %v3092_v44 = vld [vmem:[%s3825_s1 + $0x350] sm:$0xff]   ;;  %v3096_v0 = vld [vmem:[%s3825_s1 + $0x358] sm:$0xff]  }
  0x7e   : > { %2872 = vmatprep.subr.bf16.mxu1 %v3076_v47  ;;  %v597_v47 = vrot.slane %v596_v36, 4  ;;  %v497_v16 = vmax.f32 %v495_v62, %v496_v7 }
  0x7f   : > { %2851 = vmatpush3.bf16.msra.mxu0 %v3075_v48  ;;  %v1150_v17 = vpack.c.bf16 %v1106_v9, %v1106_v9  ;;  %v1107_v18 = vcombine.high %v1105_v11, %v1105_v11  ;;  %v1151_v20 = vpack.c.bf16 %v1105_v11, %v1105_v11  ;;  %v603_v48 = vsel %vm385_vm0, %v352_v14, -inf  ;;  %v3098_v9 = vld [vmem:[%s3825_s1 + $0x3d8] sm:$0xff]  }
  0x80   : > { %2852 = vmatprep.subr.bf16.mxu0 %v3078_v50  ;;  %v481_v50 = vmax.f32 %v479_v29, %v480_v39  ;;  %v598_v57 = vmax.f32 %v596_v36, %v597_v47  ;;  %v604_v58 = vrot.slane %v603_v48, 4  ;;  %v3097_v14 = vld [vmem:[%s3825_s1 + $0x318] sm:$0xff]   ;;  %v3101_v29 = vld [vmem:[%s3825_s1 + $0x320] sm:$0xff]  }
  0x81   : > { %2873 = vmatpush3.bf16.msra.mxu1 %v3077_v51  ;;  %2378 = vmatprep.mubr.bf16.mxu0 %v1150_v17  ;;  %v1152_v27 = vpack.c.bf16 %v1107_v18, %v1107_v18  ;;  %v487_v51 = vrot.slane %v486_v40, 2  ;;  %v3100_v18 = vld [vmem:[%s3825_s1 + $0x360] sm:$0xff]  }
  0x82   : > { %2874 = vmatprep.subr.bf16.mxu1 %v3080_v53  ;;  %v591_v53 = vmax.f32 %v589_v35, %v590_v42  ;;  %v599_v2 = vrot.slane %v598_v57, 2  ;;  %v605_v3 = vmax.f32 %v603_v48, %v604_v58  ;;  %v3109_v48 = vld [vmem:[%s3825_s1 + $0x330] sm:$0xff]   ;;  %v3117_v58 = vld [vmem:[%s3825_s1 + $0x3b8] sm:$0xff]  }
  0x83   : > { %2853 = vmatpush3.bf16.msra.mxu0 %v3079_v55  ;;  %2418 = vmatprep.mubr.bf16.mxu1 %v1152_v27  ;;  %v475_v55 = vrot.slane %v474_v45, 1  ;;  %v488_v61 = vmax.f32 %v486_v40, %v487_v51  ;;  %v3105_v40 = vld [vmem:[%s3825_s1 + $0x328] sm:$0xff]   ;;  %v3111_v51 = vld [vmem:[%s3825_s1 + $0x3b0] sm:$0xff]  }
  0x84   : > { %2882 = vmatprep.subr.bf16.mxu0 %v3084_v60  ;;  %v482_v60 = vrot.slane %v481_v50, 1  ;;  %v592_v63 = vrot.slane %v591_v53, 2  ;;  %v600_v12 = vmax.f32 %v598_v57, %v599_v2  ;;  %v606_v13 = vrot.slane %v605_v3, 2 }
  0x85   : > { %2875 = vmatpush3.bf16.msra.mxu1 %v3083_v1  ;;  %v586_v1 = vmax.f32 %v584_v46, %v585_v56  ;;  %v476_v5 = vmax.f32 %v474_v45, %v475_v55  ;;  %v489_v6 = vrot.slane %v488_v61, 1  ;;  %v3110_v45 = vld [vmem:[%s3825_s1 + $0x3f0] sm:$0xff]  }
  0x86   : > { %2904 = vmatprep.subr.bf16.mxu1 %v3086_v4  ;;  %2379 = vmatmul.mubr.bf16.vlgmr.msra.gmra.mrb[8].mxu0 %v1149_v10  ;;  %v3095_v4 = vld [vmem:[%s3825_s1 + $0x390] sm:$0xff]   ;;  %v593_v8 = vmax.f32 %v591_v53, %v592_v63  ;;  %v483_v10 = vmax.f32 %v481_v50, %v482_v60  ;;  %v607_v21 = vmax.f32 %v605_v3, %v606_v13 }
  0x87   : > { %2883 = vmatpush3.bf16.msra.mxu0 %v3085_v19  ;;  %v587_v11 = vrot.slane %v586_v1, 1  ;;  %v490_v15 = vmax.f32 %v488_v61, %v489_v6 }
  0x88   : > { %2419 = vmatmul.mubr.bf16.vlgmr.msra.gmra.mrb[8].mxu1 %v1151_v20  ;;  %2884 = vmatprep.subr.bf16.mxu0 %v3088_v22  ;;  %v594_v17 = vrot.slane %v593_v8, 1  ;;  %v601_v20 = vrot.slane %v600_v12, 1  ;;  %v3099_v22 = vld [vmem:[%s3825_s1 + $0x398] sm:$0xff]   ;;  %v608_v26 = vrot.slane %v607_v21, 1  ;;  %v697_v27 = vcombine.low %v476_v5, %v483_v10  ;;  %v1157_v5 = vld [vmem:[%s3826_s2] sm:$0xff] }
  0x89   : > { %2905 = vmatpush3.bf16.msra.mxu1 %v3087_v28  ;;  %v588_v19 = vmax.f32 %v586_v1, %v587_v11  ;;  %v698_v28 = vcombine.low %v490_v15, %v497_v16 }
  0x8a   : > { %2906 = vmatprep.subr.bf16.mxu1 %v3090_v32  ;;  %v595_v23 = vmax.f32 %v593_v8, %v594_v17  ;;  %v602_v25 = vmax.f32 %v600_v12, %v601_v20  ;;  %v609_v32 = vmax.f32 %v607_v21, %v608_v26  ;;  %v705_v35 = vrot.slane %v697_v27, %v3388_v43 }
  0x8b   : > { %2885 = vmatpush3.bf16.msra.mxu0 %v3089_v38  ;;  %v712_v36 = vrot.slane %v698_v28, %v3388_v43 }
  0x8c   : > { %2886 = vmatprep.subr.bf16.mxu0 %v3092_v44  ;;  %v765_v30 = vcombine.low %v588_v19, %v595_v23  ;;  %v766_v38 = vcombine.low %v602_v25, %v609_v32  ;;  %v3107_v44 = vld [vmem:[%s3825_s1 + $0x3a8] sm:$0xff]  }
  0x8d   : > { %2907 = vmatpush3.bf16.msra.mxu1 %v3091_v49  ;;  %v713_v46 = vcombine.low %v705_v35, %v712_v36  ;;  %v3112_v49 = vld [vmem:[%s3825_s1 + $0x378] sm:$0xff]  }
  0x8e   : > { %2908 = vmatprep.subr.bf16.mxu1 %v3094_v54  ;;  %v773_v39 = vrot.slane %v765_v30, %v3388_v43  ;;  %v780_v42 = vrot.slane %v766_v38, %v3388_v43  ;;  %v3113_v54 = vld [vmem:[%s3825_s1 + $0x338] sm:$0xff]  }
  0x8f   : > { %2887 = vmatpush3.bf16.msra.mxu0 %v3093_v59 }
  0x90   : > { %2888 = vmatprep.subr.bf16.mxu0 %v3096_v0  ;;  %v781_v47 = vcombine.low %v773_v39, %v780_v42 }
  0x91   : > { %2909 = vmatpush3.bf16.msra.mxu1 %v3095_v4  ;;  %v1416_v4 = vsub.s32 0, %v3379_v37 }
  0x92   : > { %2910 = vmatprep.subr.bf16.mxu1 %v3098_v9  ;;  %v811_v50 = vrot.slane %v781_v47, 7 }
  0x93   : > { %2889 = vmatpush3.bf16.msra.mxu0 %v3097_v14  ;;  %v1417_v7 = vrot.slane %v1157_v5, %v1416_v4 }
  0x94   : > { %2890 = vmatprep.subr.bf16.mxu0 %v3100_v18  ;;  %v812_v53 = vsel %vm787_vm1, %v811_v50, %v713_v46 }
  0x95   : > { %2911 = vmatpush3.bf16.msra.mxu1 %v3099_v22  ;;  %v813_v55 = vsel %vm789_vm2, %v811_v50, %v812_v53 }
  0x96   : > { %2912 = vmatprep.subr.bf16.mxu1 %v3102_v24  ;;  %v814_v56 = vsel %vm791_vm3, %v811_v50, %v813_v55  ;;  %v2514_v55 = vsub.s32 2, %v3379_v37 }
  0x97   : > { %2891 = vmatpush3.bf16.msra.mxu0 %v3101_v29  ;;  %v815_v57 = vsel %vm793_vm4, %v811_v50, %v814_v56 }
  0x98   : > { %2892 = vmatprep.subr.bf16.mxu0 %v3104_v31  ;;  %v1115_v59 = vrot.slane %v815_v57, %v3388_v43  ;;  %v1108_v60 = vcombine.high %v815_v57, %v815_v57 }
  0x99   : > { %2913 = vmatpush3.bf16.msra.mxu1 %v3103_v33 }
  0x9a   : > { %2914 = vmatprep.subr.bf16.mxu1 %v3106_v34  ;;  %v1123_v61 = vcombine.high %v1115_v59, %v1115_v59  ;;  %v1122_v62 = vrot.slane %v1108_v60, %v3388_v43  ;;  %v1153_v63 = vpack.c.bf16 %v1115_v59, %v1115_v59  ;;  %v2515_v60 = vrot.slane %v1157_v5, %v2514_v55 }
  0x9b   : > { %2893 = vmatpush3.bf16.msra.mxu0 %v3105_v40 }
  0x9c   : > { %2894 = vmatprep.subr.bf16.mxu0 %v3108_v41  ;;  %v1154_v0 = vpack.c.bf16 %v1123_v61, %v1123_v61  ;;  %v1124_v1 = vcombine.high %v1122_v62, %v1122_v62  ;;  %v1155_v2 = vpack.c.bf16 %v1122_v62, %v1122_v62 }
  0x9d   : > { %2915 = vmatpush3.bf16.msra.mxu1 %v3107_v44 }
  0x9e   : > { %2916 = vmatprep.subr.bf16.mxu1 %v3110_v45  ;;  %2458 = vmatprep.mubr.bf16.mxu0 %v1154_v0  ;;  %v1156_v3 = vpack.c.bf16 %v1124_v1, %v1124_v1 }
  0x9f   : > { %2895 = vmatpush3.bf16.msra.mxu0 %v3109_v48 }
  0xa0   : > { %2896 = vmatprep.subr.bf16.mxu0 %v3112_v49  ;;  %2498 = vmatprep.mubr.bf16.mxu1 %v1156_v3  ;;  %v2509_v49 = vsub.s32 1, %v3379_v37 }
  0xa1   : > { %2917 = vmatpush3.bf16.msra.mxu1 %v3111_v51 }
  0xa2   : > { %2918 = vmatprep.subr.bf16.mxu1 %v3114_v52 }
  0xa3   : > { %2897 = vmatpush3.bf16.msra.mxu0 %v3113_v54 }
  0xa5   : > { %2919 = vmatpush3.bf16.msra.mxu1 %v3117_v58  ;;  %v2510_v58 = vrot.slane %v1157_v5, %v2509_v49 }
  0xa6   : > { %2459 = vmatmul.mubr.bf16.vlgmr.msra.gmra.mrb[12].mxu0 %v1153_v63 }
  0xa8   : > { %2499 = vmatmul.mubr.bf16.vlgmr.msra.gmra.mrb[12].mxu1 %v1155_v2 }
 0x119   : > { %v2766_v6 = vpop.f32.mrb[0].mxu0 }
 0x11a   : > { %v2767_v8 = vpop.f32.mrb[1].mxu0 }
 0x11b   : > { %v2768_v43 = vadd.f32 %v2767_v8, %v2766_v6  ;;  %v2769_v9 = vpop.f32.mrb[2].mxu0  ;;  %v2788_v10 = vpop.f32.mrb[0].mxu1 }
 0x11c   : > { %v2770_v11 = vpop.f32.mrb[3].mxu0  ;;  %v2789_v12 = vpop.f32.mrb[1].mxu1 }
 0x11d   : > { %v2221_v13 = vadd.f32 %v2768_v43, %v1417_v7  ;;  %v2790_v14 = vadd.f32 %v2789_v12, %v2788_v10  ;;  %v2791_v15 = vpop.f32.mrb[2].mxu1 }
 0x11e   : > { %v2792_v16 = vpop.f32.mrb[3].mxu1 }
 0x11f   : > { %v2261_v17 = vadd.f32 %v2790_v14, %v2221_v13 }
 0x139   : > { %v2810_v18 = vpop.f32.mrb[4].mxu0 }
 0x13a   : > { %v2811_v19 = vpop.f32.mrb[5].mxu0 }
 0x13b   : > { %v2812_v20 = vadd.f32 %v2811_v19, %v2810_v18  ;;  %v2813_v21 = vpop.f32.mrb[6].mxu0  ;;  %v2832_v22 = vpop.f32.mrb[4].mxu1 }
 0x13c   : > { %v2814_v23 = vpop.f32.mrb[7].mxu0  ;;  %v2833_v24 = vpop.f32.mrb[5].mxu1 }
 0x13d   : > { %v2301_v25 = vadd.f32 %v2812_v20, %v2261_v17  ;;  %v2834_v26 = vadd.f32 %v2833_v24, %v2832_v22  ;;  %v2835_v27 = vpop.f32.mrb[6].mxu1 }
 0x13e   : > { %v2836_v28 = vpop.f32.mrb[7].mxu1 }
 0x13f   : > { %v2341_v29 = vadd.f32 %v2834_v26, %v2301_v25 }
 0x159   : > { %v2854_v30 = vpop.f32.mrb[8].mxu0 }
 0x15a   : > { %v2855_v31 = vpop.f32.mrb[9].mxu0 }
 0x15b   : > { %v2856_v32 = vadd.f32 %v2855_v31, %v2854_v30  ;;  %v2857_v33 = vpop.f32.mrb[10].mxu0  ;;  %v2876_v34 = vpop.f32.mrb[8].mxu1 }
 0x15c   : > { %v2858_v35 = vpop.f32.mrb[11].mxu0  ;;  %v2877_v36 = vpop.f32.mrb[9].mxu1 }
 0x15d   : > { %v2381_v38 = vadd.f32 %v2856_v32, %v2341_v29  ;;  %v2878_v39 = vadd.f32 %v2877_v36, %v2876_v34  ;;  %v2879_v40 = vpop.f32.mrb[10].mxu1 }
 0x15e   : > { %v2880_v41 = vpop.f32.mrb[11].mxu1 }
 0x15f   : > { %v2421_v42 = vadd.f32 %v2878_v39, %v2381_v38 }
 0x179   : > { %v2898_v44 = vpop.f32.mrb[12].mxu0 }
 0x17a   : > { %v2899_v45 = vpop.f32.mrb[13].mxu0 }
 0x17b   : > { %v2900_v46 = vadd.f32 %v2899_v45, %v2898_v44  ;;  %v2901_v47 = vpop.f32.mrb[14].mxu0  ;;  %v2920_v48 = vpop.f32.mrb[12].mxu1 }
 0x17c   : > { %v2902_v50 = vpop.f32.mrb[15].mxu0  ;;  %v2921_v51 = vpop.f32.mrb[13].mxu1 }
 0x17d   : > { %v2461_v52 = vadd.f32 %v2900_v46, %v2421_v42  ;;  %v2922_v53 = vadd.f32 %v2921_v51, %v2920_v48  ;;  %v2923_v54 = vpop.f32.mrb[14].mxu1 }
 0x17e   : > { %v2924_v56 = vpop.f32.mrb[15].mxu1 }
 0x17f   : > { %v2501_v57 = vadd.f32 %v2922_v53, %v2461_v52 }
 0x181   : > { %v2506_v59 = vmax.f32 %v2501_v57, 0.0 }
 0x183   : > { %v2511_v61 = vmul.f32 %v2510_v58, %v2506_v59 }
 0x185   : > { %v2516_v62 = vadd.f32 %v2515_v60, %v2511_v61 }
 0x187   : > { %2517 = vst [vmem:[%s188_s29] sm:$0x3] %v2516_v62 }
 0x188   : > { %3131 = shalt.err (!%p3128_p5)
}
 0x189   : > { %s3132_s10 = scalar_lea.hbm %s3777_s5, 32  ;;  %s3136_s21 = scalar_lea.hbm %s3827_s3, 64 }
 0x18a   : > { %p3133_p6 = scmp.ne.s32.totalorder %s3777_s5, %s3132_s10  ;;  %p3137_p10 = scmp.lt.u32.totalorder %s3777_s5, %s3827_s3 }
 0x18b   : > { %p3138_p11 = scmp.lt.u32.totalorder %s3136_s21, %s3132_s10  ;;  %p3140_p13 = scmp.lt.u32.totalorder %s3132_s10, %s3777_s5 }
 0x18c   : > { %p3134_p7 = pnand %p3133_p6, %p3260_p4 }
 0x18d   : > { %p3139_p12 = por %p3138_p11, %p3137_p10 }
 0x18e   : > { %p3135_p9 = pneg %p3134_p7 }
 0x18f   : > { %p3141_p0 = por %p3140_p13, %p3139_p12 }
 0x191   : > { %p3142_p1 = pnand %p3141_p0, %p3135_p9 }
 0x193   : > { %3145 = shalt.err (!%p3142_p1)
}
 0x194   : > { %2926 = dma.vmem_to_hbm [thread:$0]  (%p3260_p4), %s3779_s19, 32, %s3777_s5, %s2519_s6  }
 0x195 PF: > { %p2932_p2 = scmp.ge.s32.totalorder %s3196_s17, 2  ;;  %s2544_s27 = sand.u32 1, %s3176_s12  }
 0x196   : > { %s2545_s28 = scalar_lea.sflag [#allocation4], %s2544_s27 }
 0x197   : > { %p2929_p3 = pnand %p2932_p2, %p3267_p8 }
 0x199   : > { %3171 = dma.done.wait (!%p2929_p3), %s2545_s28, 32  }
 0x19a   : > { %3173 = vsyncadd (!%p2929_p3), %s2545_s28, 4294967264  ;;  %s16_s17 = sadd.s32 1, %s3196_s17   ;;  %s3830_s12 = smov %s3180_s13 }
 0x19b   : > { %p13_p5 = scmp.ge.s32.totalorder %s16_s17, 4   ;;  %s3831_s13 = smov %s3184_s14 }
 0x19c   : > { %s3832_s14 = smov %s3273_s25  ;;  %s3833_s15 = smov %s3192_s16 }
 0x19d   : > { %s3834_s16 = smov %s3836_s20  ;;  %15 = sbr.rel (!%p13_p5) target bundleno = 4 (0x4), region = 79 }
 0x1a4   :  { %2550 = vsyncpa [#allocation4], 1 }
 0x1a5   :  { %2552 = vsyncpa [#allocation4 + $0x1], 1 }

</bundles_post_ra>
